<compile_context>
chip_gen: v7x
topology: tpu7x:2x2x1
jax: 0.10.0
libtpu: 0.0.40
codegen_flags: <defaults>
</compile_context>

<pallas_src>
import functools
import math

import jax
import jax.numpy as jnp
from jax.experimental import pallas as pl
from jax.experimental.pallas import tpu as pltpu

LANE = 128


def _focal_loss_kernel(x_ref, t_ref, o_ref, *, alpha: float, gamma: float):
    x = x_ref[...].astype(jnp.float32)
    t = t_ref[...].astype(jnp.float32)

    # Shared transcendental: e = exp(-|x|), reused by sigmoid and BCE.
    e = jnp.exp(-jnp.abs(x))
    inv_1pe = 1.0 / (1.0 + e)
    # sigmoid(x): x>=0 -> 1/(1+e),  x<0 -> e/(1+e)   (e = exp(-|x|))
    p = jnp.where(x >= 0.0, 1.0, e) * inv_1pe

    # Numerically-stable binary_cross_entropy_with_logits (reduction='none'):
    #   ce = max(x, 0) - x*t + log(1 + exp(-|x|))
    ce = jnp.maximum(x, 0.0) - x * t + jnp.log1p(e)

    p_t = p * t + (1.0 - p) * (1.0 - t)
    one_m_pt = 1.0 - p_t

    if gamma == 2.0:                      # default: square, not pow()
        mod = one_m_pt * one_m_pt
    elif gamma == 1.0:
        mod = one_m_pt
    elif gamma == 0.0:
        mod = jnp.ones_like(one_m_pt)
    else:
        mod = one_m_pt ** gamma

    loss = ce * mod

    if alpha >= 0:
        alpha_t = alpha * t + (1.0 - alpha) * (1.0 - t)
        loss = alpha_t * loss

    o_ref[...] = loss


def focal_loss(inputs, targets, alpha: float = 0.25, gamma: float = 2.0,
               reduction=None, block_rows: int = 4096):
    """Pallas TPU focal loss. Matches the PyTorch module's forward()."""
    assert inputs.shape == targets.shape
    orig_shape = inputs.shape
    n = math.prod(orig_shape) if orig_shape else 1

    # Stream inputs in their NATIVE dtype (cast happens in-kernel).
    x = inputs.reshape((n,))
    t = targets.reshape((n,))

    # Fast path: n is a multiple of 128 -> pure reshape, no pad / slice copies.
    padded = (n % LANE) != 0
    if padded:
        n_slab = ((n + LANE - 1) // LANE) * LANE
        x = jnp.pad(x, (0, n_slab - n))
        t = jnp.pad(t, (0, n_slab - n))
    else:
        n_slab = n
    rows = n_slab // LANE
    x2 = x.reshape((rows, LANE))
    t2 = t.reshape((rows, LANE))

    # Fixed large row tile; grid via cdiv with a masked partial last block.
    # block_rows is kept a multiple of 32 (covers f32 / bf16 / int8 packing).
    block_rows = max(32, (block_rows // 32) * 32)
    if rows <= block_rows:
        tile_r = rows            # full array dim -> always a legal block shape
    else:
        tile_r = block_rows
    grid = (pl.cdiv(rows, tile_r),)

    kernel = functools.partial(_focal_loss_kernel,
                               alpha=float(alpha), gamma=float(gamma))

    out2 = pl.pallas_call(
        kernel,
        out_shape=jax.ShapeDtypeStruct((rows, LANE), jnp.float32),
        grid_spec=pltpu.PrefetchScalarGridSpec(
            num_scalar_prefetch=0,
            grid=grid,
            in_specs=[
                pl.BlockSpec((tile_r, LANE), lambda i: (i, 0)),
                pl.BlockSpec((tile_r, LANE), lambda i: (i, 0)),
            ],
            out_specs=pl.BlockSpec((tile_r, LANE), lambda i: (i, 0)),
        ),
        compiler_params=pltpu.CompilerParams(
            dimension_semantics=("parallel",),
            # Explicit scoped-VMEM budget: v5e's 16 MiB default is too tight
            # for 3 operands x 2 pipeline buffers at 2 MiB blocks; 48 MiB is
            # safely under v7x's 64 MiB physical VMEM.
            vmem_limit_bytes=48 * 1024 * 1024),
    )(x2, t2)

    if padded:
        loss = out2.reshape((n_slab,))[:n].reshape(orig_shape)
    else:
        loss = out2.reshape(orig_shape)

    if reduction == "mean":
        loss = loss.mean()
    elif reduction == "sum":
        loss = loss.sum()
    return loss


def _focal_loss_ref(inputs, targets, alpha=0.25, gamma=2.0, reduction=None):
    """Plain-JAX reference matching the PyTorch forward exactly."""
    x = inputs.astype(jnp.float32)
    t = targets.astype(jnp.float32)
    p = jax.nn.sigmoid(x)
    ce = jnp.maximum(x, 0.0) - x * t + jnp.log1p(jnp.exp(-jnp.abs(x)))
    p_t = p * t + (1.0 - p) * (1.0 - t)
    loss = ce * (1.0 - p_t) ** gamma
    if alpha >= 0:
        alpha_t = alpha * t + (1.0 - alpha) * (1.0 - t)
        loss = alpha_t * loss
    if reduction == "mean":
        loss = loss.mean()
    elif reduction == "sum":
        loss = loss.sum()
    return loss


if __name__ == "__main__":
    key = jax.random.PRNGKey(0)
    k1, k2, k3, k4 = jax.random.split(key, 4)

    # Case 1: small NCHW f32 logits, elementwise output (reduction=None).
    shape = (2, 4, 16, 16)
    inputs = jax.random.normal(k1, shape, dtype=jnp.float32) * 2.0
    targets = jax.random.bernoulli(k2, p=0.3, shape=shape).astype(jnp.float32)

    out = focal_loss(inputs, targets, alpha=0.25, gamma=2.0, reduction=None)
    out = jax.block_until_ready(out)
    ref = _focal_loss_ref(inputs, targets, alpha=0.25, gamma=2.0, reduction=None)
    assert out.shape == shape and out.dtype == jnp.float32
    assert jnp.allclose(out, ref, atol=1e-5, rtol=1e-5), "mismatch vs reference (case 1)"

    # Case 2: bf16 logits + ragged length (exercises native-dtype path,
    # the padded fallback, and 'mean' reduction).
    shape2 = (3, 5, 7)   # 105 elems -> not a multiple of 128
    inputs2 = (jax.random.normal(k3, shape2, dtype=jnp.float32) * 2.0).astype(jnp.bfloat16)
    targets2 = jax.random.bernoulli(k4, p=0.5, shape=shape2)

    out2 = focal_loss(inputs2, targets2, alpha=0.25, gamma=2.0, reduction="mean")
    out2 = jax.block_until_ready(out2)
    ref2 = _focal_loss_ref(inputs2, targets2, alpha=0.25, gamma=2.0, reduction="mean")
    assert jnp.allclose(out2, ref2, atol=1e-5, rtol=1e-5), "mismatch vs reference (case 2)"

    print("KERNEL_OK")
</pallas_src>

<mosaic_0001>
module attributes {stable_mosaic.version = 11 : i64} {
  func.func @_focal_loss_kernel(%arg0: i32, %arg1: memref<16x128xf32, #tpu.memory_space<vmem>>, %arg2: memref<16x128xf32, #tpu.memory_space<vmem>>, %arg3: memref<16x128xf32, #tpu.memory_space<vmem>>) attributes {dimension_semantics = [#tpu.dimension_semantics<parallel>], iteration_bounds = array<i64: 1>, scalar_prefetch = 0 : i64, scratch_operands = 0 : i64, tpu.core_type = #tpu.core_type<tc>, window_params = [{transform_indices = @transform_0, window_bounds = array<i64: 16, 128>}, {transform_indices = @transform_1, window_bounds = array<i64: 16, 128>}, {transform_indices = @transform_2, window_bounds = array<i64: 16, 128>}]} {
    %c0 = arith.constant 0 : index
    %c0_0 = arith.constant 0 : index
    %0 = vector.load %arg1[%c0, %c0_0] : memref<16x128xf32, #tpu.memory_space<vmem>>, vector<16x128xf32>
    %c0_1 = arith.constant 0 : index
    %c0_2 = arith.constant 0 : index
    %1 = vector.load %arg2[%c0_1, %c0_2] : memref<16x128xf32, #tpu.memory_space<vmem>>, vector<16x128xf32>
    %2 = math.absf %0 : vector<16x128xf32>
    %cst = arith.constant 0.000000e+00 : f32
    %3 = vector.broadcast %cst : f32 to vector<16x128xf32>
    %4 = arith.subf %3, %2 : vector<16x128xf32>
    %5 = math.exp %4 : vector<16x128xf32>
    %cst_3 = arith.constant 1.000000e+00 : f32
    %6 = vector.broadcast %cst_3 : f32 to vector<16x128xf32>
    %7 = arith.addf %6, %5 : vector<16x128xf32>
    %cst_4 = arith.constant 1.000000e+00 : f32
    %8 = vector.broadcast %cst_4 : f32 to vector<16x128xf32>
    %9 = arith.divf %8, %7 : vector<16x128xf32>
    %cst_5 = arith.constant 0.000000e+00 : f32
    %10 = vector.broadcast %cst_5 : f32 to vector<16x128xf32>
    %11 = arith.cmpf oge, %0, %10 : vector<16x128xf32>
    %cst_6 = arith.constant 1.000000e+00 : f32
    %12 = vector.broadcast %cst_6 : f32 to vector<16x128xf32>
    %13 = arith.select %11, %12, %5 : vector<16x128xi1>, vector<16x128xf32>
    %14 = arith.mulf %13, %9 : vector<16x128xf32>
    %cst_7 = arith.constant 0.000000e+00 : f32
    %15 = vector.broadcast %cst_7 : f32 to vector<16x128xf32>
    %16 = arith.maximumf %0, %15 : vector<16x128xf32>
    %17 = arith.mulf %0, %1 : vector<16x128xf32>
    %18 = arith.subf %16, %17 : vector<16x128xf32>
    %19 = math.log1p %5 : vector<16x128xf32>
    %20 = arith.addf %18, %19 : vector<16x128xf32>
    %21 = arith.mulf %14, %1 : vector<16x128xf32>
    %cst_8 = arith.constant 1.000000e+00 : f32
    %22 = vector.broadcast %cst_8 : f32 to vector<16x128xf32>
    %23 = arith.subf %22, %14 : vector<16x128xf32>
    %cst_9 = arith.constant 1.000000e+00 : f32
    %24 = vector.broadcast %cst_9 : f32 to vector<16x128xf32>
    %25 = arith.subf %24, %1 : vector<16x128xf32>
    %26 = arith.mulf %23, %25 : vector<16x128xf32>
    %27 = arith.addf %21, %26 : vector<16x128xf32>
    %cst_10 = arith.constant 1.000000e+00 : f32
    %28 = vector.broadcast %cst_10 : f32 to vector<16x128xf32>
    %29 = arith.subf %28, %27 : vector<16x128xf32>
    %30 = arith.mulf %29, %29 : vector<16x128xf32>
    %31 = arith.mulf %20, %30 : vector<16x128xf32>
    %cst_11 = arith.constant 2.500000e-01 : f32
    %32 = vector.broadcast %cst_11 : f32 to vector<16x128xf32>
    %33 = arith.mulf %32, %1 : vector<16x128xf32>
    %cst_12 = arith.constant 1.000000e+00 : f32
    %34 = vector.broadcast %cst_12 : f32 to vector<16x128xf32>
    %35 = arith.subf %34, %1 : vector<16x128xf32>
    %cst_13 = arith.constant 7.500000e-01 : f32
    %36 = vector.broadcast %cst_13 : f32 to vector<16x128xf32>
    %37 = arith.mulf %36, %35 : vector<16x128xf32>
    %38 = arith.addf %33, %37 : vector<16x128xf32>
    %39 = arith.mulf %38, %31 : vector<16x128xf32>
    %c0_14 = arith.constant 0 : index
    %c0_15 = arith.constant 0 : index
    %40 = vector.load %arg3[%c0_14, %c0_15] : memref<16x128xf32, #tpu.memory_space<vmem>>, vector<16x128xf32>
    tpu.vector_store %arg3[%c0_14, %c0_15], %39 {strides = array<i32>} : memref<16x128xf32, #tpu.memory_space<vmem>>, vector<16x128xf32>,
    return
  }
  func.func @transform_0(%arg0: i32) -> (i32, i32) {
    %c0_i32 = arith.constant 0 : i32
    %c0_i32_0 = arith.constant 0 : i32
    return %arg0, %c0_i32 : i32, i32
  }
  func.func @transform_1(%arg0: i32) -> (i32, i32) {
    %c0_i32 = arith.constant 0 : i32
    %c0_i32_0 = arith.constant 0 : i32
    return %arg0, %c0_i32 : i32, i32
  }
  func.func @transform_2(%arg0: i32) -> (i32, i32) {
    %c0_i32 = arith.constant 0 : i32
    %c0_i32_0 = arith.constant 0 : i32
    return %arg0, %c0_i32 : i32, i32
  }
}

</mosaic_0001>

<bundles_post_ra>
// kernel: tpu_custom_call.1
= control target key start
LH: loop header
LB: loop body
LE: loop exit
PB: predicated region body
PF: predicated region fallthrough
CT: control target
= control target key end

     0   :  { %7 = vsyncpa [#allocation3], 0  ;;  %s300_s0 = inlined_call_operand.hbm [shape: f32[16,128], index: 0, kind: input, shape index: {}]   ;;  %s301_s1 = inlined_call_operand.hbm [shape: f32[16,128], index: 1, kind: input, shape index: {}]   ;;  %s302_s2 = inlined_call_operand.hbm [shape: f32[16,128], index: 2, kind: output, shape index: {}]  }
   0x1   :  { %8 = vsyncpa [#allocation6], 0 }
   0x2   :  { %9 = vsyncpa [#allocation4], 0  ;;  %s223_s9 = smov [#allocation2]   ;;  %s151_s13 = scalar_lea.hbm %s300_s0, 256 }
   0x3   :  { %s15_s10 = sshll.u32 %s223_s9, 4  ;;  %p152_p0 = scmp.ne.s32.totalorder %s300_s0, %s151_s13  ;;  %s16_s10 = int_to_ptr.vmem [resolvable:$true] %s15_s10 }
   0x4   :  { %p155_p1 = scmp.lt.u32.totalorder %s151_s13, %s300_s0 }
   0x6   :  { %p157_p2 = pnand %p155_p1, %p152_p0 }
   0x8   :  { %160 = shalt.err (!%p157_p2)
}
   0x9   :  { %s161_s18 = scalar_lea.vmem %s16_s10, 256  ;;  %p166_p4 = scmp.lt.s32.totalorder %s16_s10, %s16_s10 }
   0xa   :  { %p162_p3 = scmp.ne.s32.totalorder %s16_s10, %s161_s18  ;;  %p167_p5 = scmp.lt.s32.totalorder %s161_s18, %s161_s18 }
   0xc   :  { %p168_p6 = por %p167_p5, %p166_p4 }
   0xe   :  { %p169_p7 = pnand %p168_p6, %p162_p3 }
  0x10   :  { %172 = shalt.err (!%p169_p7)
}
  0x11   :  { %s224_s19 = smov 128   ;;  %s225_s20 = smov 8  }
  0x12   :  { %21 = dma.hbm_to_vmem [thread:$0]  %s300_s0, 256, %s16_s10, [#allocation3], %s224_s19, %s224_s19, %s225_s20  }
  0x13   :  { %s226_s23 = smov [#allocation5]   ;;  %s173_s27 = scalar_lea.hbm %s301_s1, 256 }
  0x14   :  { %s27_s24 = sshll.u32 %s226_s23, 4  ;;  %p174_p8 = scmp.ne.s32.totalorder %s301_s1, %s173_s27  ;;  %s28_s24 = int_to_ptr.vmem [resolvable:$true] %s27_s24 }
  0x15   :  { %p177_p9 = scmp.lt.u32.totalorder %s173_s27, %s301_s1 }
  0x17   :  { %p179_p10 = pnand %p177_p9, %p174_p8 }
  0x19   :  { %182 = shalt.err (!%p179_p10)
}
  0x1a   :  { %s183_s4 = scalar_lea.vmem %s28_s24, 256  ;;  %p188_p12 = scmp.lt.s32.totalorder %s28_s24, %s28_s24 }
  0x1b   :  { %p184_p11 = scmp.ne.s32.totalorder %s28_s24, %s183_s4  ;;  %p189_p13 = scmp.lt.s32.totalorder %s183_s4, %s183_s4 }
  0x1d   :  { %p190_p0 = por %p189_p13, %p188_p12 }
  0x1f   :  { %p191_p1 = pnand %p190_p0, %p184_p11 }
  0x21   :  { %194 = shalt.err (!%p191_p1)
}
  0x22   :  { %33 = dma.hbm_to_vmem [thread:$0]  %s301_s1, 256, %s28_s24, [#allocation6], %s224_s19, %s224_s19, %s225_s20  }
  0x23   :  { %217 = dma.done.wait [#allocation3], 256  }
  0x24   :  { %218 = vsyncadd [#allocation3], 4294967040 }
  0x25   :  { %219 = dma.done.wait [#allocation6], 256  }
  0x26   :  { %220 = vsyncadd [#allocation6], 4294967040  ;;  %v40_v0 = vld [vmem:[#allocation2] sm:$0xff]  ;;  %v41_v1 = vld [vmem:[#allocation2 + $0x8] sm:$0xff]  ;;  %s227_s1 = smov [#allocation7]  }
  0x27   :  { %v44_v2 = vand.u32 2147483647, %v40_v0  ;;  %v45_v3 = vand.u32 2147483647, %v41_v1  ;;  %vm58_vm0 = vcmp.ge.f32.partialorder %v40_v0, 0.0  ;;  %vm59_vm1 = vcmp.ge.f32.partialorder %v41_v1, 0.0 }
  0x28   :  { %v42_v14 = vld [vmem:[#allocation5] sm:$0xff]  ;;  %v43_v18 = vld [vmem:[#allocation5 + $0x8] sm:$0xff]  ;;  %v64_v20 = vmax.f32 %v40_v0, 0.0  ;;  %v65_v27 = vmax.f32 %v41_v1, 0.0  ;;  %s121_s6 = sshll.u32 %s227_s1, 4  ;;  %s122_s6 = int_to_ptr.vmem [resolvable:$true] %s121_s6 }
  0x29   :  { %v46_v4 = vsub.f32 0.0, %v44_v2  ;;  %v47_v5 = vsub.f32 0.0, %v45_v3  ;;  %v66_v21 = vmul.f32 %v42_v14, %v40_v0  ;;  %v94_v26 = vsub.f32 1.0, %v42_v14  ;;  %s195_s7 = scalar_lea.vmem %s122_s6, 256  ;;  %p200_p3 = scmp.lt.s32.totalorder %s122_s6, %s122_s6 }
  0x2a   :  { %v67_v32 = vmul.f32 %v43_v18, %v41_v1  ;;  %v95_v33 = vsub.f32 1.0, %v43_v18  ;;  %v106_v47 = vmul.f32 0.25, %v42_v14  ;;  %v107_v53 = vmul.f32 0.25, %v43_v18  ;;  %p196_p2 = scmp.ne.s32.totalorder %s122_s6, %s195_s7  ;;  %p201_p4 = scmp.lt.s32.totalorder %s195_s7, %s195_s7 }
  0x2b   :  { %v48_v6 = vmul.f32 1.442695, %v46_v4  ;;  %v50_v7 = vmul.f32 1.442695, %v47_v5  ;;  %v68_v39 = vsub.f32 %v64_v20, %v66_v21  ;;  %v108_v49 = vmul.f32 0.75, %v94_v26 }
  0x2c   :  { %v69_v50 = vsub.f32 %v65_v27, %v67_v32  ;;  %v109_v57 = vmul.f32 0.75, %v95_v33  ;;  %p202_p5 = por %p201_p4, %p200_p3 }
  0x2d   :  { %139 = vpow2.f32 %v48_v6  ;;  %v110_v59 = vadd.f32 %v108_v49, %v106_v47 }
  0x2e   :  { %141 = vpow2.f32 %v50_v7  ;;  %v111_v0 = vadd.f32 %v109_v57, %v107_v53  ;;  %p203_p6 = pnand %p202_p5, %p196_p2 }
  0x37   :  { %v140_v8 = vpop.eup %139 }
  0x38   :  { %v142_v9 = vpop.eup %141  ;;  %v52_v10 = vadd.f32 1.0, %v140_v8  ;;  %v73_v12 = vmul.f32 -0.5, %v140_v8  ;;  %v60_v15 = vsel %vm58_vm0, 1.0, %v140_v8  ;;  %v76_v17 = vand.u32 2147483647, %v140_v8 }
  0x39   :  { %v53_v11 = vadd.f32 1.0, %v142_v9  ;;  %v82_v13 = vmul.f32 -0.5, %v142_v9  ;;  %v61_v22 = vsel %vm59_vm1, 1.0, %v142_v9  ;;  %v85_v28 = vand.u32 2147483647, %v142_v9 }
  0x3a   :  { %143 = vrcp.f32 %v52_v10  ;;  %v74_v16 = vadd.f32 1.0, %v73_v12  ;;  %vm273_vm2 = vcmp.lt.f32.partialorder %v76_v17, 0.0004427343 }
  0x3b   :  { %145 = vlog2.f32 %v52_v10  ;;  %v83_v23 = vadd.f32 1.0, %v82_v13  ;;  %vm277_vm3 = vcmp.lt.f32.partialorder %v85_v28, 0.0004427343 }
  0x3c   :  { %147 = vrcp.f32 %v53_v11  ;;  %v75_v31 = vmul.f32 %v140_v8, %v74_v16 }
  0x3d   :  { %149 = vlog2.f32 %v53_v11  ;;  %v84_v41 = vmul.f32 %v142_v9, %v83_v23 }
  0x44   :  { %v144_v19 = vpop.eup %143 }
  0x45   :  { %v146_v24 = vpop.eup %145  ;;  %v62_v25 = vmul.f32 %v144_v19, %v60_v15 }
  0x46   :  { %v148_v29 = vpop.eup %147  ;;  %v72_v30 = vmul.f32 0.6931472, %v146_v24 }
  0x47   :  { %v150_v34 = vpop.eup %149  ;;  %v90_v36 = vmul.f32 %v62_v25, %v42_v14  ;;  %v92_v37 = vsub.f32 1.0, %v62_v25  ;;  %v63_v38 = vmul.f32 %v148_v29, %v61_v22 }
  0x48   :  { %v81_v40 = vmul.f32 0.6931472, %v150_v34  ;;  %v78_v46 = vsel %vm273_vm2, %v75_v31, %v72_v30 }
  0x49   :  { %v96_v42 = vmul.f32 %v94_v26, %v92_v37  ;;  %v91_v44 = vmul.f32 %v63_v38, %v43_v18  ;;  %v93_v45 = vsub.f32 1.0, %v63_v38  ;;  %v88_v54 = vadd.f32 %v78_v46, %v68_v39 }
  0x4a   :  { %v87_v52 = vsel %vm277_vm3, %v84_v41, %v81_v40 }
  0x4b   :  { %v98_v48 = vadd.f32 %v96_v42, %v90_v36  ;;  %v97_v51 = vmul.f32 %v95_v33, %v93_v45  ;;  %v89_v60 = vadd.f32 %v87_v52, %v69_v50 }
  0x4d   :  { %v100_v55 = vsub.f32 1.0, %v98_v48  ;;  %v99_v56 = vadd.f32 %v97_v51, %v91_v44 }
  0x4f   :  { %v102_v58 = vmul.f32 %v100_v55, %v100_v55  ;;  %v101_v61 = vsub.f32 1.0, %v99_v56 }
  0x51   :  { %v104_v62 = vmul.f32 %v102_v58, %v88_v54  ;;  %v103_v63 = vmul.f32 %v101_v61, %v101_v61 }
  0x53   :  { %v112_v1 = vmul.f32 %v110_v59, %v104_v62  ;;  %v105_v2 = vmul.f32 %v103_v63, %v89_v60 }
  0x55   :  { %114 = vst [vmem:[#allocation7] sm:$0xff] %v112_v1  ;;  %v113_v3 = vmul.f32 %v111_v0, %v105_v2 }
  0x57   :  { %115 = vst [vmem:[#allocation7 + $0x8] sm:$0xff] %v113_v3 }
  0x58   :  { %206 = shalt.err (!%p203_p6)
}
  0x59   :  { %s207_s10 = scalar_lea.hbm %s302_s2, 256 }
  0x5a   :  { %p208_p7 = scmp.ne.s32.totalorder %s302_s2, %s207_s10  ;;  %p211_p8 = scmp.lt.u32.totalorder %s207_s10, %s302_s2 }
  0x5c   :  { %p213_p9 = pnand %p211_p8, %p208_p7 }
  0x5e   :  { %216 = shalt.err (!%p213_p9)
}
  0x5f   :  { %127 = dma.vmem_to_hbm [thread:$0]  %s122_s6, 256, %s302_s2, [#allocation4], %s224_s19, %s224_s19, %s225_s20  }
  0x60   :  { %221 = dma.done.wait [#allocation4], 256  }
  0x61   :  { %222 = vsyncadd [#allocation4], 4294967040 }
  0x62   :  { %131 = vsyncpa [#allocation3], 1 }
  0x63   :  { %132 = vsyncpa [#allocation6], 1 }
  0x64   :  { %133 = vsyncpa [#allocation4], 1 }

</bundles_post_ra>
